<compile_context>
chip_gen: v6e
topology: v6e:2x2x1
jax: 0.10.0
libtpu: 0.0.40
codegen_flags: <defaults>
</compile_context>

<pallas_src>
import functools

import jax
import jax.numpy as jnp
from jax.experimental import pallas as pl
from jax.experimental.pallas import tpu as pltpu

_INV_SQRT2 = 0.7071067811865476  # 1/sqrt(2), folded as an immediate


def _round_up(x, m):
    return ((x + m - 1) // m) * m


def _round_down(x, m):
    return (x // m) * m


def _scaled_gelu_kernel(x_ref, alpha_ref, o_ref, *, row_tile, alpha_resident):
    x = x_ref[...].astype(jnp.float32)
    # Exact (erf-based) GELU, matching torch.nn.functional.gelu default.
    g = x * 0.5 * (1.0 + jax.lax.erf(x * _INV_SQRT2))
    if alpha_resident:
        # alpha_ref holds the full (rows_p, 1) column; slice our row block.
        r0 = pl.multiple_of(pl.program_id(0) * row_tile, 8)
        a = alpha_ref[pl.ds(r0, row_tile), :]
    else:
        a = alpha_ref[...]  # (row_tile, 1) block for this row slab
    o_ref[...] = (a * g).astype(o_ref.dtype)  # (rows, 1) broadcasts over lanes


def output_scaled_gelu(x, alpha, *, target_block_bytes=2 << 20):
    """x: (N, C, H, W), alpha: (C,). Returns alpha[c] * gelu(x) (exact GELU)."""
    N, C, H, W = x.shape
    rows, cols = N * C, H * W
    dtype = x.dtype
    dtype_bytes = jnp.dtype(dtype).itemsize
    sub = max(8, 32 // dtype_bytes)  # min sublane tile for the I/O dtype
    lane = 128

    # ---- choose block sizes targeting ~target_block_bytes per x/out block ----
    cols_p = _round_up(cols, lane)  # lane-dense output
    elems_target = max(sub * lane, target_block_bytes // dtype_bytes)
    if cols_p * sub >= elems_target:
        # Even `sub` rows of the full width exceed the target: tile columns.
        row_tile = sub
        col_tile = min(cols_p, max(lane, _round_down(elems_target // sub, lane)))
    else:
        col_tile = cols_p
        row_tile = max(sub, _round_down(elems_target // cols_p, sub))
    row_tile = min(row_tile, _round_up(rows, sub))

    # Keep >= 2 grid steps when we can, so both v7x TensorCores get work.
    if (pl.cdiv(rows, row_tile) * pl.cdiv(cols_p, col_tile) == 1
            and row_tile > sub and rows > sub):
        row_tile = max(sub, _round_up(row_tile // 2, sub))

    rows_p = _round_up(rows, row_tile)
    cols_p = _round_up(cols_p, col_tile)
    n_row_blocks = rows_p // row_tile
    n_col_blocks = cols_p // col_tile

    # ---- build 2-D views (pad only if needed so the grid divides evenly) ----
    x2d = x.reshape(rows, cols)
    alpha_col = jnp.tile(alpha, (N,)).reshape(rows, 1).astype(jnp.float32)
    pad_r, pad_c = rows_p - rows, cols_p - cols
    if pad_r or pad_c:
        x2d = jnp.pad(x2d, ((0, pad_r), (0, pad_c)))
    if pad_r:
        alpha_col = jnp.pad(alpha_col, ((0, pad_r), (0, 0)))

    # alpha resident in VMEM (DMA'd once) unless N*C is absurdly large.
    alpha_resident = rows_p * lane * 4 <= (2 << 20)
    if alpha_resident:
        a_spec = pl.BlockSpec((rows_p, 1), lambda i, j: (0, 0))
    else:
        a_spec = pl.BlockSpec((row_tile, 1), lambda i, j: (i, 0))

    kernel = functools.partial(
        _scaled_gelu_kernel, row_tile=row_tile, alpha_resident=alpha_resident)

    out2d = pl.pallas_call(
        kernel,
        out_shape=jax.ShapeDtypeStruct((rows_p, cols_p), dtype),
        grid=(n_row_blocks, n_col_blocks),
        in_specs=[
            pl.BlockSpec((row_tile, col_tile), lambda i, j: (i, j)),
            a_spec,
        ],
        out_specs=pl.BlockSpec((row_tile, col_tile), lambda i, j: (i, j)),
        compiler_params=pltpu.CompilerParams(
            dimension_semantics=("parallel", "parallel")),
    )(x2d, alpha_col)

    if pad_r or pad_c:
        out2d = out2d[:rows, :cols]
    return out2d.reshape(N, C, H, W)


if __name__ == "__main__":
    key = jax.random.PRNGKey(0)
    kx, ka = jax.random.split(key)

    # Small shape consistent with the module's forward (NCHW).
    N, C, H, W = 2, 4, 16, 16
    x = jax.random.normal(kx, (N, C, H, W), dtype=jnp.float32)

    # Deterministic parameter init mirroring the module's __init__:
    # alpha = randn(C) normalized to unit L2 norm.
    alpha = jax.random.normal(ka, (C,), dtype=jnp.float32)
    alpha = alpha / jnp.linalg.norm(alpha)

    out = output_scaled_gelu(x, alpha)
    out = jax.block_until_ready(out)

    ref = alpha.reshape(1, C, 1, 1) * jax.nn.gelu(x, approximate=False)
    assert out.shape == (N, C, H, W)
    assert jnp.allclose(out, ref, atol=1e-5, rtol=1e-5)

    # Extra check: non-lane-aligned spatial dims exercise the padding path.
    x2 = jax.random.normal(kx, (2, 3, 7, 7), dtype=jnp.float32)
    a2 = jax.random.normal(ka, (3,), dtype=jnp.float32)
    a2 = a2 / jnp.linalg.norm(a2)
    out2 = jax.block_until_ready(output_scaled_gelu(x2, a2))
    ref2 = a2.reshape(1, 3, 1, 1) * jax.nn.gelu(x2, approximate=False)
    assert jnp.allclose(out2, ref2, atol=1e-5, rtol=1e-5)

    print("KERNEL_OK")
</pallas_src>

<mosaic_0001>
module attributes {stable_mosaic.version = 11 : i64} {
  func.func @_scaled_gelu_kernel(%arg0: i32, %arg1: i32, %arg2: memref<8x256xf32, #tpu.memory_space<vmem>>, %arg3: memref<8x1xf32, #tpu.memory_space<vmem>>, %arg4: memref<8x256xf32, #tpu.memory_space<vmem>>) attributes {dimension_semantics = [#tpu.dimension_semantics<parallel>, #tpu.dimension_semantics<parallel>], iteration_bounds = array<i64: 1, 1>, scalar_prefetch = 0 : i64, scratch_operands = 0 : i64, tpu.core_type = #tpu.core_type<tc>, window_params = [{transform_indices = @transform_0, window_bounds = array<i64: 8, 256>}, {pipeline_mode = #tpu.pipeline_mode<synchronous>, transform_indices = @transform_1, window_bounds = array<i64: 8, 1>}, {transform_indices = @transform_2, window_bounds = array<i64: 8, 256>}]} {
    %c0 = arith.constant 0 : index
    %c0_0 = arith.constant 0 : index
    %0 = vector.load %arg2[%c0, %c0_0] : memref<8x256xf32, #tpu.memory_space<vmem>>, vector<8x256xf32>
    %cst = arith.constant 5.000000e-01 : f32
    %1 = vector.broadcast %cst : f32 to vector<8x256xf32>
    %2 = arith.mulf %0, %1 : vector<8x256xf32>
    %cst_1 = arith.constant 0.707106769 : f32
    %3 = vector.broadcast %cst_1 : f32 to vector<8x256xf32>
    %4 = arith.mulf %0, %3 : vector<8x256xf32>
    %5 = math.erf %4 : vector<8x256xf32>
    %cst_2 = arith.constant 1.000000e+00 : f32
    %6 = vector.broadcast %cst_2 : f32 to vector<8x256xf32>
    %7 = arith.addf %6, %5 : vector<8x256xf32>
    %8 = arith.mulf %2, %7 : vector<8x256xf32>
    %c8_i32 = arith.constant 8 : i32
    %9 = arith.muli %arg0, %c8_i32 : i32
    %10 = tpu.assume_multiple %9, 8 : i32
    %11 = arith.index_cast %10 : i32 to index
    %c0_3 = arith.constant 0 : index
    %12 = vector.load %arg3[%11, %c0_3] : memref<8x1xf32, #tpu.memory_space<vmem>>, vector<8x1xf32>
    %13 = vector.broadcast %12 : vector<8x1xf32> to vector<8x256xf32>
    %14 = arith.mulf %13, %8 : vector<8x256xf32>
    %c0_4 = arith.constant 0 : index
    %c0_5 = arith.constant 0 : index
    %15 = vector.load %arg4[%c0_4, %c0_5] : memref<8x256xf32, #tpu.memory_space<vmem>>, vector<8x256xf32>
    tpu.vector_store %arg4[%c0_4, %c0_5], %14 {strides = array<i32>} : memref<8x256xf32, #tpu.memory_space<vmem>>, vector<8x256xf32>,
    return
  }
  func.func @transform_0(%arg0: i32, %arg1: i32) -> (i32, i32) {
    %c0_i32 = arith.constant 0 : i32
    return %arg0, %arg1 : i32, i32
  }
  func.func @transform_1(%arg0: i32, %arg1: i32) -> (i32, i32) {
    %c0_i32 = arith.constant 0 : i32
    %c0_i32_0 = arith.constant 0 : i32
    %c0_i32_1 = arith.constant 0 : i32
    return %c0_i32, %c0_i32_0 : i32, i32
  }
  func.func @transform_2(%arg0: i32, %arg1: i32) -> (i32, i32) {
    %c0_i32 = arith.constant 0 : i32
    return %arg0, %arg1 : i32, i32
  }
}

</mosaic_0001>

<bundles_post_ra>
// kernel: tpu_custom_call.1
= control target key start
LH: loop header
LB: loop body
LE: loop exit
PB: predicated region body
PF: predicated region fallthrough
CT: control target
= control target key end

     0   :  { %7 = vsyncpa [#allocation3], 0  ;;  %s142_s0 = inlined_call_operand.hbm [shape: f32[8,256], index: 0, kind: input, shape index: {}]   ;;  %s143_s1 = inlined_call_operand.vmem [shape: f32[8,1], index: 1, kind: input, shape index: {}]   ;;  %s144_s2 = inlined_call_operand.hbm [shape: f32[8,256], index: 2, kind: output, shape index: {}]  }
   0x1   :  { %8 = vsyncpa [#allocation4], 0  ;;  %s115_s9 = smov [#allocation2]  }
   0x2   :  { %s15_s10 = sshll.u32 %s115_s9, 4  ;;  %s16_s10 = int_to_ptr.vmem [resolvable:$true] %s15_s10 }
   0x3   :  { %s79_s11 = scalar_lea.vmem %s16_s10, 256  ;;  %p84_p1 = scmp.lt.s32.totalorder %s16_s10, %s16_s10 }
   0x4   :  { %p80_p0 = scmp.ne.s32.totalorder %s16_s10, %s79_s11  ;;  %p85_p2 = scmp.lt.s32.totalorder %s79_s11, %s79_s11 }
   0x6   :  { %p86_p3 = por %p85_p2, %p84_p1 }
   0x8   :  { %p87_p4 = pnand %p86_p3, %p80_p0 }
   0xa   :  { %90 = shalt.err (!%p87_p4)
}
   0xb   :  { %18 = dma.hbm_to_vmem [thread:$0]  %s142_s0, 256, %s16_s10, [#allocation3]  }
   0xc   :  { %111 = dma.done.wait [#allocation3], 256  }
   0xd   :  { %112 = vsyncadd [#allocation3], 4294967040  ;;  %v116_v0 = vmov 0   ;;  %v38_v1 = vld [vmem:[%s143_s1] sm:$0xff]  ;;  %v25_v3 = vld [vmem:[#allocation2 + $0x8] sm:$0xff]  ;;  %s117_s0 = smov [#allocation5]  }
   0xe   :  { %66 = vset.pattern.permute.xlu0 %v116_v0  ;;  %v24_v2 = vld [vmem:[#allocation2] sm:$0xff]  ;;  %v29_v5 = vmul.f32 0.70710677, %v25_v3  ;;  %v27_v9 = vmul.f32 0.5, %v25_v3  ;;  %s54_s16 = sshll.u32 %s117_s0, 4  ;;  %s55_s16 = int_to_ptr.vmem [resolvable:$true] %s54_s16 }
   0xf   :  { %41 = vperm.xlu0 %66, %v38_v1   ;;  %v28_v4 = vmul.f32 0.70710677, %v24_v2  ;;  %v26_v8 = vmul.f32 0.5, %v24_v2  ;;  %s91_s1 = scalar_lea.vmem %s55_s16, 256  ;;  %p96_p6 = scmp.lt.s32.totalorder %s55_s16, %s55_s16 }
  0x10   :  { %p92_p5 = scmp.ne.s32.totalorder %s55_s16, %s91_s1  ;;  %p97_p7 = scmp.lt.s32.totalorder %s91_s1, %s91_s1 }
  0x11   :  { %67 = verf.f32 %v28_v4 }
  0x12   :  { %69 = verf.f32 %v29_v5  ;;  %p98_p8 = por %p97_p7, %p96_p6 }
  0x14   :  { %p99_p9 = pnand %p98_p8, %p92_p5 }
  0x1e   :  { %v68_v6 = vpop.eup %67 }
  0x1f   :  { %v70_v7 = vpop.eup %69  ;;  %v32_v10 = vadd.f32 1.0, %v68_v6 }
  0x20   :  { %v33_v11 = vadd.f32 1.0, %v70_v7 }
  0x21   :  { %v34_v12 = vmul.f32 %v32_v10, %v26_v8 }
  0x22   :  { %v35_v13 = vmul.f32 %v33_v11, %v27_v9 }
  0x8a   :  { %v42_v14 = vpop.permute.xlu0 %41 }
  0x8b   :  { %v44_v15 = vmul.f32 %v42_v14, %v34_v12  ;;  %v45_v16 = vmul.f32 %v42_v14, %v35_v13 }
  0x8d   :  { %46 = vst [vmem:[#allocation5] sm:$0xff] %v44_v15  ;;  %47 = vst [vmem:[#allocation5 + $0x8] sm:$0xff] %v45_v16 }
  0x8e   :  { %102 = shalt.err (!%p99_p9)
}
  0x8f   :  { %57 = dma.vmem_to_hbm [thread:$0]  %s55_s16, 256, %s144_s2, [#allocation4]  }
  0x90   :  { %113 = dma.done.wait [#allocation4], 256  }
  0x91   :  { %114 = vsyncadd [#allocation4], 4294967040 }
  0x92   :  { %61 = vsyncpa [#allocation3], 1 }
  0x93   :  { %62 = vsyncpa [#allocation4], 1 }

</bundles_post_ra>
